<compile_context>
chip_gen: v7x
topology: tpu7x:2x2x1
jax: 0.10.0
libtpu: 0.0.40
codegen_flags: <defaults>
</compile_context>

<pallas_src>
import jax
import jax.numpy as jnp
from jax.experimental import pallas as pl
from jax.experimental.pallas import tpu as pltpu

_VMEM_LIMIT = 32 * 1024 * 1024          # scoped-VMEM request (safe on v5e/v6e/v7x)
_SMALL_MAX_DIM = 2048                   # IN, OUT each <= this -> fully-resident path
_SMALL_MAX_W_BYTES = 4 * 1024 * 1024    # and whole weight <= 4 MiB
_K_RESIDENT_MAX_BYTES = 4096            # INp * itemsize <= this -> drop the k axis


def _round_up(v, m):
    return ((v + m - 1) // m) * m


# --------------------------------------------------------------- kernels ----

def _linear_kres_kernel(x_ref, w_ref, b_ref, o_ref):
    """Single-shot tile: o = x @ w + b (full K resident in the tile)."""
    acc = jnp.dot(x_ref[...], w_ref[...], preferred_element_type=jnp.float32)
    o_ref[...] = (acc + b_ref[...].astype(jnp.float32)).astype(o_ref.dtype)


def _linear_ktiled_f32_kernel(x_ref, w_ref, b_ref, o_ref):
    """K-tiled, f32 output: accumulate directly into the resident o_ref."""
    @pl.when(pl.program_id(2) == 0)
    def _():
        o_ref[...] = jnp.broadcast_to(
            b_ref[...].astype(o_ref.dtype), o_ref.shape)

    o_ref[...] += jnp.dot(
        x_ref[...], w_ref[...], preferred_element_type=jnp.float32)


def _linear_ktiled_acc_kernel(x_ref, w_ref, b_ref, o_ref, acc_ref):
    """K-tiled, non-f32 output: f32 VMEM accumulator, bias + cast on last k."""
    k = pl.program_id(2)

    @pl.when(k == 0)
    def _():
        acc_ref[...] = jnp.zeros_like(acc_ref)

    acc_ref[...] += jnp.dot(
        x_ref[...], w_ref[...], preferred_element_type=jnp.float32)

    @pl.when(k == pl.num_programs(2) - 1)
    def _():
        o_ref[...] = (acc_ref[...] + b_ref[...].astype(jnp.float32)).astype(
            o_ref.dtype)


# ----------------------------------------------------- one-time weight prep ---

def prepare_linear_params(weight, bias, *, tn=512, tk=512, compute_dtype=None):
    """Hoisted, call-once prep of nn.Linear params.

    Transposes W to (IN, OUT) so OUT is the lane-dense MXU axis, optionally
    casts it (e.g. jnp.bfloat16 for v6e/v7x), and pre-pads it for the tiled
    path so no per-forward transpose/pad HBM traffic remains.
    """
    OUT, IN = weight.shape
    w_t = weight.T                                  # (IN, OUT)
    if compute_dtype is not None:
        w_t = w_t.astype(compute_dtype)
    b_row = bias.astype(jnp.float32).reshape(1, OUT)
    itemsize = jnp.dtype(w_t.dtype).itemsize

    small = (IN <= _SMALL_MAX_DIM and OUT <= _SMALL_MAX_DIM
             and IN * OUT * itemsize <= _SMALL_MAX_W_BYTES)
    if small:
        return dict(mode="small", w=w_t, b=b_row,
                    in_features=IN, out_features=OUT, tn=OUT, tk=IN)

    tn_eff = min(tn, _round_up(OUT, 128))
    tk_eff = min(tk, _round_up(IN, 128))
    INp = _round_up(IN, tk_eff)
    OUTp = _round_up(OUT, tn_eff)
    w_p = jnp.pad(w_t, ((0, INp - IN), (0, OUTp - OUT)))
    b_p = jnp.pad(b_row, ((0, 0), (0, OUTp - OUT)))
    return dict(mode="tiled", w=w_p, b=b_p,
                in_features=IN, out_features=OUT, tn=tn_eff, tk=tk_eff)


# -------------------------------------------------------------- forward ------

def linear_forward(x, params, *, tm=512):
    """y = x @ W^T + b using pre-prepared params from prepare_linear_params."""
    B, IN = x.shape
    assert IN == params["in_features"], "input feature mismatch"
    OUT = params["out_features"]
    w, b = params["w"], params["b"]

    out_dtype = x.dtype
    if x.dtype != w.dtype:
        x = x.astype(w.dtype)
    itemsize = jnp.dtype(w.dtype).itemsize
    out_itemsize = jnp.dtype(out_dtype).itemsize

    tm_eff = min(tm, _round_up(B, 8))
    Bp = _round_up(B, tm_eff)

    # --------------------------- small path: IN & OUT fully resident --------
    if params["mode"] == "small":
        xp = jnp.pad(x, ((0, Bp - B), (0, 0))) if Bp != B else x
        grid = (Bp // tm_eff,)
        cost = pl.CostEstimate(
            flops=2 * B * IN * OUT, transcendentals=0,
            bytes_accessed=int(itemsize * (Bp * IN + IN * OUT)
                               + out_itemsize * Bp * OUT))
        out = pl.pallas_call(
            _linear_kres_kernel,
            out_shape=jax.ShapeDtypeStruct((Bp, OUT), out_dtype),
            grid=grid,
            in_specs=[
                pl.BlockSpec((tm_eff, IN), lambda i: (i, 0)),   # x batch tile
                pl.BlockSpec((IN, OUT), lambda i: (0, 0)),      # whole W^T
                pl.BlockSpec((1, OUT), lambda i: (0, 0)),       # bias
            ],
            out_specs=pl.BlockSpec((tm_eff, OUT), lambda i: (i, 0)),
            compiler_params=pltpu.CompilerParams(
                dimension_semantics=("parallel",),
                vmem_limit_bytes=_VMEM_LIMIT),
            cost_estimate=cost,
        )(xp, w, b)
        return out[:B] if Bp != B else out

    # --------------------------------------------------------- tiled path ---
    INp, OUTp = w.shape
    tn_eff, tk_eff = params["tn"], params["tk"]
    xp = x
    if (Bp, INp) != (B, IN):
        xp = jnp.pad(xp, ((0, Bp - B), (0, INp - IN)))
    grid_i, grid_j = Bp // tm_eff, OUTp // tn_eff

    cost = pl.CostEstimate(
        flops=2 * B * IN * OUT, transcendentals=0,
        bytes_accessed=int(itemsize * (Bp * INp * grid_j + INp * OUTp * grid_i)
                           + out_itemsize * Bp * OUTp))

    if INp * itemsize <= _K_RESIDENT_MAX_BYTES:
        # K-resident: 2-D grid, no accumulator, no per-k grid-step overhead.
        out = pl.pallas_call(
            _linear_kres_kernel,
            out_shape=jax.ShapeDtypeStruct((Bp, OUTp), out_dtype),
            grid=(grid_i, grid_j),
            in_specs=[
                pl.BlockSpec((tm_eff, INp), lambda i, j: (i, 0)),
                pl.BlockSpec((INp, tn_eff), lambda i, j: (0, j)),
                pl.BlockSpec((1, tn_eff), lambda i, j: (0, j)),
            ],
            out_specs=pl.BlockSpec((tm_eff, tn_eff), lambda i, j: (i, j)),
            compiler_params=pltpu.CompilerParams(
                dimension_semantics=("parallel", "parallel"),
                vmem_limit_bytes=_VMEM_LIMIT),
            cost_estimate=cost,
        )(xp, w, b)
    else:
        grid_k = INp // tk_eff
        common = dict(
            out_shape=jax.ShapeDtypeStruct((Bp, OUTp), out_dtype),
            grid=(grid_i, grid_j, grid_k),
            in_specs=[
                pl.BlockSpec((tm_eff, tk_eff), lambda i, j, k: (i, k)),
                pl.BlockSpec((tk_eff, tn_eff), lambda i, j, k: (k, j)),
                pl.BlockSpec((1, tn_eff), lambda i, j, k: (0, j)),
            ],
            out_specs=pl.BlockSpec((tm_eff, tn_eff), lambda i, j, k: (i, j)),
            compiler_params=pltpu.CompilerParams(
                dimension_semantics=("parallel", "parallel", "arbitrary"),
                vmem_limit_bytes=_VMEM_LIMIT),
            cost_estimate=cost,
        )
        if out_dtype == jnp.float32:
            # Output block is resident across k -> accumulate into it directly.
            out = pl.pallas_call(_linear_ktiled_f32_kernel, **common)(xp, w, b)
        else:
            out = pl.pallas_call(
                _linear_ktiled_acc_kernel,
                scratch_shapes=[pltpu.VMEM((tm_eff, tn_eff), jnp.float32)],
                **common)(xp, w, b)

    if (Bp, OUTp) != (B, OUT):
        out = out[:B, :OUT]
    return out


# ------------------------------------------------------------------ test -----

if __name__ == "__main__":
    key = jax.random.PRNGKey(0)

    # --- Test 1: the nn.Linear spec at small shapes ("small" resident path) --
    kx, kw, kb = jax.random.split(key, 3)
    batch, inp_size, out_size = 8, 32, 8
    x = jax.random.normal(kx, (batch, inp_size), dtype=jnp.float32)
    bound = 1.0 / jnp.sqrt(jnp.float32(inp_size))
    weight = jax.random.uniform(
        kw, (out_size, inp_size), dtype=jnp.float32, minval=-bound, maxval=bound)
    bias = jax.random.uniform(
        kb, (out_size,), dtype=jnp.float32, minval=-bound, maxval=bound)

    params = prepare_linear_params(weight, bias)   # hoisted, done once
    y = linear_forward(x, params)
    jax.block_until_ready(y)
    y_ref = x @ weight.T + bias
    assert y.shape == y_ref.shape, "shape mismatch vs reference (small path)"
    assert jnp.allclose(y, y_ref, atol=1e-5, rtol=1e-5), "mismatch (small path)"

    # --- Test 2: K-tiled 3-D path (large IN), f32 accumulate-into-output -----
    k2x, k2w, k2b = jax.random.split(jax.random.PRNGKey(1), 3)
    B2, IN2, OUT2 = 96, 2304, 384
    x2 = jax.random.normal(k2x, (B2, IN2), dtype=jnp.float32)
    w2 = jax.random.normal(k2w, (OUT2, IN2), dtype=jnp.float32) * 0.02
    b2 = jax.random.normal(k2b, (OUT2,), dtype=jnp.float32) * 0.02
    p2 = prepare_linear_params(w2, b2)
    y2 = linear_forward(x2, p2)
    jax.block_until_ready(y2)
    y2_ref = x2 @ w2.T + b2
    assert y2.shape == y2_ref.shape, "shape mismatch vs reference (ktiled path)"
    assert jnp.allclose(y2, y2_ref, atol=5e-4, rtol=5e-4), "mismatch (ktiled)"

    # --- Test 3: tiled K-resident path (large OUT, moderate IN) --------------
    k3x, k3w, k3b = jax.random.split(jax.random.PRNGKey(2), 3)
    B3, IN3, OUT3 = 64, 640, 2176
    x3 = jax.random.normal(k3x, (B3, IN3), dtype=jnp.float32)
    w3 = jax.random.normal(k3w, (OUT3, IN3), dtype=jnp.float32) * 0.02
    b3 = jax.random.normal(k3b, (OUT3,), dtype=jnp.float32) * 0.02
    p3 = prepare_linear_params(w3, b3)
    y3 = linear_forward(x3, p3)
    jax.block_until_ready(y3)
    y3_ref = x3 @ w3.T + b3
    assert y3.shape == y3_ref.shape, "shape mismatch vs reference (kres path)"
    assert jnp.allclose(y3, y3_ref, atol=5e-4, rtol=5e-4), "mismatch (kres)"

    print("KERNEL_OK")
</pallas_src>

<mosaic_0001>
module attributes {stable_mosaic.version = 11 : i64} {
  func.func @_linear_kres_kernel(%arg0: i32, %arg1: memref<8x32xf32, #tpu.memory_space<vmem>>, %arg2: memref<32x8xf32, #tpu.memory_space<vmem>>, %arg3: memref<1x8xf32, #tpu.memory_space<vmem>>, %arg4: memref<8x8xf32, #tpu.memory_space<vmem>>) attributes {dimension_semantics = [#tpu.dimension_semantics<parallel>], iteration_bounds = array<i64: 1>, scalar_prefetch = 0 : i64, scratch_operands = 0 : i64, tpu.core_type = #tpu.core_type<tc>, window_params = [{transform_indices = @transform_0, window_bounds = array<i64: 8, 32>}, {pipeline_mode = #tpu.pipeline_mode<synchronous>, transform_indices = @transform_1, window_bounds = array<i64: 32, 8>}, {pipeline_mode = #tpu.pipeline_mode<synchronous>, transform_indices = @transform_2, window_bounds = array<i64: 1, 8>}, {transform_indices = @transform_3, window_bounds = array<i64: 8, 8>}]} {
    %c0 = arith.constant 0 : index
    %c0_0 = arith.constant 0 : index
    %0 = vector.load %arg1[%c0, %c0_0] : memref<8x32xf32, #tpu.memory_space<vmem>>, vector<8x32xf32>
    %c0_1 = arith.constant 0 : index
    %c0_2 = arith.constant 0 : index
    %1 = vector.load %arg2[%c0_1, %c0_2] : memref<32x8xf32, #tpu.memory_space<vmem>>, vector<32x8xf32>
    %cst = arith.constant dense<0.000000e+00> : vector<8x8xf32>
    %2 = tpu.matmul %0, %1, %cst {dimension_numbers = #tpu.dot_dimension_numbers<[1], [0], [0], [1], [0, 0, 1, 1], [], []>} : vector<8x32xf32>, vector<32x8xf32>, vector<8x8xf32> -> vector<8x8xf32>
    %c0_3 = arith.constant 0 : index
    %c0_4 = arith.constant 0 : index
    %3 = vector.load %arg3[%c0_3, %c0_4] : memref<1x8xf32, #tpu.memory_space<vmem>>, vector<1x8xf32>
    %4 = vector.broadcast %3 : vector<1x8xf32> to vector<8x8xf32>
    %5 = arith.addf %2, %4 : vector<8x8xf32>
    %c0_5 = arith.constant 0 : index
    %c0_6 = arith.constant 0 : index
    %6 = vector.load %arg4[%c0_5, %c0_6] : memref<8x8xf32, #tpu.memory_space<vmem>>, vector<8x8xf32>
    tpu.vector_store %arg4[%c0_5, %c0_6], %5 {strides = array<i32>} : memref<8x8xf32, #tpu.memory_space<vmem>>, vector<8x8xf32>,
    return
  }
  func.func @transform_0(%arg0: i32) -> (i32, i32) {
    %c0_i32 = arith.constant 0 : i32
    %c0_i32_0 = arith.constant 0 : i32
    return %arg0, %c0_i32 : i32, i32
  }
  func.func @transform_1(%arg0: i32) -> (i32, i32) {
    %c0_i32 = arith.constant 0 : i32
    %c0_i32_0 = arith.constant 0 : i32
    %c0_i32_1 = arith.constant 0 : i32
    return %c0_i32, %c0_i32_0 : i32, i32
  }
  func.func @transform_2(%arg0: i32) -> (i32, i32) {
    %c0_i32 = arith.constant 0 : i32
    %c0_i32_0 = arith.constant 0 : i32
    %c0_i32_1 = arith.constant 0 : i32
    return %c0_i32, %c0_i32_0 : i32, i32
  }
  func.func @transform_3(%arg0: i32) -> (i32, i32) {
    %c0_i32 = arith.constant 0 : i32
    %c0_i32_0 = arith.constant 0 : i32
    return %arg0, %c0_i32 : i32, i32
  }
}

</mosaic_0001>

<bundles_post_ra>
// kernel: tpu_custom_call.1
= control target key start
LH: loop header
LB: loop body
LE: loop exit
PB: predicated region body
PF: predicated region fallthrough
CT: control target
= control target key end

     0   :  { %v169_v3 = vmov 0.0|0.0   ;;  %vm170_vm0 = vmmov 0   ;;  %v171_v6 = vmov 0.0   ;;  %s223_s0 = inlined_call_operand.vmem [shape: f32[8,32], index: 0, kind: input, shape index: {}]   ;;  %s224_s1 = inlined_call_operand.vmem [shape: f32[32,8], index: 1, kind: input, shape index: {}]   ;;  %s225_s2 = inlined_call_operand.vmem [shape: f32[1,8], index: 2, kind: input, shape index: {}]   ;;  %s226_s3 = inlined_call_operand.hbm [shape: f32[8,8], index: 3, kind: output, shape index: {}]  }
   0x1   :  { %v16_v0 = vld [vmem:[%s224_s1] sm:$0xff]  ;;  %v17_v1 = vld [vmem:[%s224_s1 + $0x8] sm:$0xff]  ;;  %v18_v2 = vld [vmem:[%s224_s1 + $0x10] sm:$0xff]  ;;  %135 = vmatprep.subr.bf16.mxu0 %v169_v3  ;;  %132 = vmatprep.mubr.msk.f32.mxu0 %vm170_vm0, %v171_v6 }
   0x2   :  { %v136_v4 = vpack.c.bf16 %v17_v1, %v16_v0  ;;  %v19_v5 = vld [vmem:[%s224_s1 + $0x18] sm:$0xff] }
   0x3   :  { %8 = vsyncpa [#allocation3], 0  ;;  %v139_v7 = vpack.c.bf16 %v19_v5, %v18_v2  ;;  %v15_v8 = vld [vmem:[%s223_s0] sm:$0xff]  ;;  %vm27_vm1 = vcmask 261120   ;;  %s172_s24 = smov [#allocation2]   ;;  %vm101_vm2 = vcmask 64512  }
   0x4   :  { %137 = vmatpush3.bf16.msra.mxu0 %v136_v4  ;;  %v117_v9 = vld [vmem:[%s225_s2] ss:$0 sm:$0xff]  ;;  %s109_s1 = sshll.u32 %s172_s24, 4  ;;  %s110_s1 = int_to_ptr.vmem [resolvable:$true] %s109_s1 }
   0x5   :  { %138 = vmatprep.subr.bf16.mxu0 %v169_v3  ;;  %s145_s25 = scalar_lea.vmem %s110_s1, 128  ;;  %p150_p1 = scmp.lt.s32.totalorder %s110_s1, %s110_s1 }
   0x6   :  { %p146_p0 = scmp.ne.s32.totalorder %s110_s1, %s145_s25  ;;  %p151_p2 = scmp.lt.s32.totalorder %s145_s25, %s145_s25 }
   0x8   :  { %140 = vmatpush3.bf16.msra.mxu0 %v139_v7  ;;  %p152_p3 = por %p151_p2, %p150_p1 }
   0xa   :  { %p153_p4 = pnand %p152_p3, %p146_p0 }
   0xb   :  { %133 = vmatmul.mubr.msk.f32.vlgmr.msra.gmra.mrb[0].mxu0 %vm27_vm1, %v15_v8 }
  0xde   :  { %v97_v10 = vpop.f32.mrb[0].mxu0 }
  0xdf   :  { %v98_v11 = vadd.f32 %v117_v9, %v97_v10  ;;  %v134_v12 = vpop.f32.mrb[1].mxu0 }
  0xe1   :  { %102 = vst.msk [vmem:[#allocation2] sm:$0xff] %vm101_vm2, %v98_v11 }
  0xe2   :  { %156 = shalt.err (!%p153_p4)
}
  0xe3   :  { %s157_s27 = scalar_lea.hbm %s226_s3, 128 }
  0xe4   :  { %p158_p5 = scmp.ne.s32.totalorder %s226_s3, %s157_s27  ;;  %p161_p6 = scmp.lt.u32.totalorder %s157_s27, %s226_s3 }
  0xe6   :  { %p163_p7 = pnand %p161_p6, %p158_p5 }
  0xe8   :  { %166 = shalt.err (!%p163_p7)
}
  0xe9   :  { %112 = dma.vmem_to_hbm [thread:$0]  %s110_s1, 128, %s226_s3, [#allocation3]  }
  0xea   :  { %167 = dma.done.wait [#allocation3], 128  }
  0xeb   :  { %168 = vsyncadd [#allocation3], 4294967168 }
  0xec   :  { %116 = vsyncpa [#allocation3], 1 }

</bundles_post_ra>
